<compile_context>
chip_gen: v5e
topology: v5e:2x2
jax: 0.10.0
libtpu: 0.0.40
codegen_flags: <defaults>
</compile_context>

<pallas_src>
import jax
import jax.numpy as jnp
from jax.experimental import pallas as pl
from jax.experimental.pallas import tpu as pltpu

LANE = 128       # vreg lane width
SUBLANE = 8      # f32 sublane count
HIDDEN = 128
MAX_TB = 2048    # batch tile upper bound; working set stays far under VMEM


def _round_up(x, m):
    return ((x + m - 1) // m) * m


def dqn_kernel(x_ref, w1_ref, b1_ref, w2_ref, b2_ref, w3_ref, b3_ref, o_ref,
               xpad_ref):
    """One batch tile: y = relu(relu(x@W1+b1)@W2+b2)@W3+b3 (f32 accumulate).

    x_ref is the narrow (TB, num_states) tile; it is zero-extended into the
    (TB, K_pad) VMEM scratch so the first matmul keeps a lane-aligned
    contracting dim.  The last matmul runs at N_pad=128 on the VMEM-resident
    padded W3, but only the first num_actions lanes are stored to HBM.
    """
    cdt = w1_ref.dtype                 # MXU input dtype (bf16 or f32)
    ns = x_ref.shape[-1]               # true num_states
    na = o_ref.shape[-1]               # true num_actions

    # Zero-extend x into the padded scratch.  Zeroing every iteration (instead
    # of only at program_id==0) keeps this correct when the batch axis is
    # sharded across TensorCores (each core has its own scratch instance).
    xpad_ref[...] = jnp.zeros_like(xpad_ref)
    xpad_ref[:, :ns] = x_ref[...]

    h1 = jnp.dot(xpad_ref[...], w1_ref[...],
                 preferred_element_type=jnp.float32) + b1_ref[...]
    h1 = jnp.maximum(h1, 0.0).astype(cdt)      # bias/ReLU in f32, cast for MXU

    h2 = jnp.dot(h1, w2_ref[...],
                 preferred_element_type=jnp.float32) + b2_ref[...]
    h2 = jnp.maximum(h2, 0.0).astype(cdt)

    acc = jnp.dot(h2, w3_ref[...], preferred_element_type=jnp.float32)
    o_ref[...] = acc[:, :na] + b3_ref[...]     # narrow (num_actions-wide) store


def prepare_params(params, compute_dtype=jnp.bfloat16):
    """One-time weight prep (hoisted out of the per-step forward path): cast to
    the MXU input dtype and zero-pad the feature dims that must be lane-aligned
    for the in-kernel matmuls.  Weights are stored [in_features, out_features].
    Zero-padded rows/cols contribute exactly 0, so results are unchanged."""
    ns, H = params["w1"].shape
    na = params["w3"].shape[1]
    K_pad = _round_up(ns, LANE)
    N_pad = _round_up(na, LANE)
    cdt = compute_dtype

    w1 = jnp.zeros((K_pad, H), cdt).at[:ns, :].set(params["w1"].astype(cdt))
    w2 = params["w2"].astype(cdt)
    w3 = jnp.zeros((H, N_pad), cdt).at[:, :na].set(params["w3"].astype(cdt))
    b1 = params["b1"].astype(jnp.float32).reshape(1, H)
    b2 = params["b2"].astype(jnp.float32).reshape(1, H)
    b3 = params["b3"].astype(jnp.float32).reshape(1, na)
    return {"w1": w1, "b1": b1, "w2": w2, "b2": b2, "w3": w3, "b3": b3,
            "num_states": ns, "num_actions": na}


def dqn_forward(x, prepared, *, max_tb=MAX_TB):
    """x: [B, num_states] f32.  prepared: output of prepare_params()."""
    B, ns = x.shape
    w1, w2, w3 = prepared["w1"], prepared["w2"], prepared["w3"]
    b1, b2, b3 = prepared["b1"], prepared["b2"], prepared["b3"]
    assert ns == prepared["num_states"]
    K_pad, H = w1.shape
    N_pad = w3.shape[1]
    na = prepared["num_actions"]
    cdt = w1.dtype
    itemsize = jnp.dtype(cdt).itemsize

    # Batch tiling: minimal padding (<SUBLANE wasted rows per tile); force a
    # >=2-tile grid on larger batches so v7x can shard across both cores.
    n_tiles = pl.cdiv(B, max_tb)
    if B >= 256:
        n_tiles = max(n_tiles, 2)
    TB = _round_up(pl.cdiv(B, n_tiles), SUBLANE)
    B_pad = n_tiles * TB

    xc = x.astype(cdt)
    if B_pad != B:
        xc = jnp.zeros((B_pad, ns), cdt).at[:B, :].set(xc)

    # VMEM budget derived from the actual buffers (double-buffered x/out tiles,
    # resident weights, padded-x scratch, f32 intermediates) + headroom.
    weight_bytes = ((w1.size + w2.size + w3.size) * itemsize
                    + (b1.size + b2.size + b3.size) * 4)
    tile_bytes = TB * ns * itemsize + TB * na * 4
    scratch_bytes = TB * K_pad * itemsize
    interm_bytes = (2 * TB * H + TB * N_pad) * 4
    vmem_needed = 2 * tile_bytes + 2 * weight_bytes + scratch_bytes + interm_bytes
    vmem_limit = int(min(max(2 * vmem_needed, 16 * 1024 * 1024),
                         64 * 1024 * 1024))

    flops = 2 * B_pad * (K_pad * H + H * H + H * N_pad)
    bytes_accessed = (B_pad * ns * itemsize        # x read
                      + weight_bytes               # weights/biases read
                      + B_pad * na * 4)            # y write

    out = pl.pallas_call(
        dqn_kernel,
        out_shape=jax.ShapeDtypeStruct((B_pad, na), jnp.float32),
        grid=(n_tiles,),
        in_specs=[
            # x: pipelined narrow tile (last block dim == full array dim).
            pl.BlockSpec((TB, ns), lambda i: (i, 0)),
            # Weights/biases stay VMEM-resident across grid iterations.
            pl.BlockSpec((K_pad, H), lambda i: (0, 0)),
            pl.BlockSpec((1, H), lambda i: (0, 0)),
            pl.BlockSpec((H, H), lambda i: (0, 0)),
            pl.BlockSpec((1, H), lambda i: (0, 0)),
            pl.BlockSpec((H, N_pad), lambda i: (0, 0)),
            pl.BlockSpec((1, na), lambda i: (0, 0)),
        ],
        # Output: narrow (TB, num_actions) block — no padded writeback.
        out_specs=pl.BlockSpec((TB, na), lambda i: (i, 0)),
        scratch_shapes=[pltpu.VMEM((TB, K_pad), cdt)],
        compiler_params=pltpu.CompilerParams(
            dimension_semantics=("parallel",),   # megacore sharding on v7x
            vmem_limit_bytes=vmem_limit,
        ),
        cost_estimate=pl.CostEstimate(
            flops=flops, transcendentals=0, bytes_accessed=bytes_accessed),
    )(xc, w1, b1, w2, b2, w3, b3)

    return out if B_pad == B else out[:B]


def init_params(key, num_states, num_actions, hidden=HIDDEN):
    """Deterministic init mimicking nn.Linear's U(-1/sqrt(fan_in), 1/sqrt(fan_in)).
    Weights stored as [in_features, out_features] (transposed vs. PyTorch)."""
    ks = jax.random.split(key, 6)

    def lin(kw, kb, fan_in, fan_out):
        bound = 1.0 / jnp.sqrt(jnp.float32(fan_in))
        w = jax.random.uniform(kw, (fan_in, fan_out), jnp.float32, -bound, bound)
        b = jax.random.uniform(kb, (1, fan_out), jnp.float32, -bound, bound)
        return w, b

    w1, b1 = lin(ks[0], ks[1], num_states, hidden)
    w2, b2 = lin(ks[2], ks[3], hidden, hidden)
    w3, b3 = lin(ks[4], ks[5], hidden, num_actions)
    return {"w1": w1, "b1": b1, "w2": w2, "b2": b2, "w3": w3, "b3": b3}


def reference_forward(x, p):
    h1 = jnp.maximum(x @ p["w1"] + p["b1"], 0.0)
    h2 = jnp.maximum(h1 @ p["w2"] + p["b2"], 0.0)
    return h2 @ p["w3"] + p["b3"]


if __name__ == "__main__":
    key = jax.random.PRNGKey(0)
    k_param, k_x, k_x2 = jax.random.split(key, 3)

    batch = 8
    num_states = 4     # e.g. CartPole observation dim
    num_actions = 2    # e.g. CartPole action dim

    params = init_params(k_param, num_states, num_actions)
    x = jax.random.normal(k_x, (batch, num_states), jnp.float32)
    ref = reference_forward(x, params)

    # f32 MXU-input path: near-exact match to the reference math.
    prep_f32 = prepare_params(params, compute_dtype=jnp.float32)
    out_f32 = jax.block_until_ready(dqn_forward(x, prep_f32))
    assert out_f32.shape == (batch, num_actions)
    assert jnp.allclose(out_f32, ref, atol=1e-4, rtol=1e-4)

    # Default bf16 MXU-input path (f32 accumulate) — the recommended config.
    prep_bf16 = prepare_params(params)            # compute_dtype=bf16 default
    out_bf16 = jax.block_until_ready(dqn_forward(x, prep_bf16))
    assert out_bf16.shape == (batch, num_actions)
    assert jnp.allclose(out_bf16, ref, atol=5e-2, rtol=5e-2)

    # Larger, non-tile-aligned batch: exercises the multi-tile grid, minimal
    # batch padding (B=300 -> two 152-row tiles) and the final row slice.
    x_big = jax.random.normal(k_x2, (300, num_states), jnp.float32)
    ref_big = reference_forward(x_big, params)
    out_big = jax.block_until_ready(dqn_forward(x_big, prep_bf16))
    assert out_big.shape == (300, num_actions)
    assert jnp.allclose(out_big, ref_big, atol=5e-2, rtol=5e-2)

    print("KERNEL_OK")
</pallas_src>

<mosaic_0001>
module attributes {stable_mosaic.version = 11 : i64} {
  func.func @dqn_kernel(%arg0: i32, %arg1: memref<8x4xf32, #tpu.memory_space<vmem>>, %arg2: memref<128x128xf32, #tpu.memory_space<vmem>>, %arg3: memref<1x128xf32, #tpu.memory_space<vmem>>, %arg4: memref<128x128xf32, #tpu.memory_space<vmem>>, %arg5: memref<1x128xf32, #tpu.memory_space<vmem>>, %arg6: memref<128x128xf32, #tpu.memory_space<vmem>>, %arg7: memref<1x2xf32, #tpu.memory_space<vmem>>, %arg8: memref<8x2xf32, #tpu.memory_space<vmem>>, %arg9: memref<8x128xf32, #tpu.memory_space<vmem>>) attributes {dimension_semantics = [#tpu.dimension_semantics<parallel>], iteration_bounds = array<i64: 1>, scalar_prefetch = 0 : i64, scratch_operands = 1 : i64, tpu.core_type = #tpu.core_type<tc>, window_params = [{transform_indices = @transform_0, window_bounds = array<i64: 8, 4>}, {pipeline_mode = #tpu.pipeline_mode<synchronous>, transform_indices = @transform_1, window_bounds = array<i64: 128, 128>}, {pipeline_mode = #tpu.pipeline_mode<synchronous>, transform_indices = @transform_2, window_bounds = array<i64: 1, 128>}, {pipeline_mode = #tpu.pipeline_mode<synchronous>, transform_indices = @transform_3, window_bounds = array<i64: 128, 128>}, {pipeline_mode = #tpu.pipeline_mode<synchronous>, transform_indices = @transform_4, window_bounds = array<i64: 1, 128>}, {pipeline_mode = #tpu.pipeline_mode<synchronous>, transform_indices = @transform_5, window_bounds = array<i64: 128, 128>}, {pipeline_mode = #tpu.pipeline_mode<synchronous>, transform_indices = @transform_6, window_bounds = array<i64: 1, 2>}, {transform_indices = @transform_7, window_bounds = array<i64: 8, 2>}]} {
    %cst = arith.constant 0.000000e+00 : f32
    %0 = vector.broadcast %cst : f32 to vector<8x128xf32>
    %c0 = arith.constant 0 : index
    %c0_0 = arith.constant 0 : index
    %1 = vector.load %arg9[%c0, %c0_0] : memref<8x128xf32, #tpu.memory_space<vmem>>, vector<8x128xf32>
    tpu.vector_store %arg9[%c0, %c0_0], %0 {strides = array<i32>} : memref<8x128xf32, #tpu.memory_space<vmem>>, vector<8x128xf32>,
    %c0_1 = arith.constant 0 : index
    %c0_2 = arith.constant 0 : index
    %2 = vector.load %arg1[%c0_1, %c0_2] : memref<8x4xf32, #tpu.memory_space<vmem>>, vector<8x4xf32>
    %c0_3 = arith.constant 0 : index
    %c0_4 = arith.constant 0 : index
    %3 = vector.load %arg9[%c0_3, %c0_4] : memref<8x128xf32, #tpu.memory_space<vmem>>, vector<8x4xf32>
    tpu.vector_store %arg9[%c0_3, %c0_4], %2 {strides = array<i32>} : memref<8x128xf32, #tpu.memory_space<vmem>>, vector<8x4xf32>,
    %c0_5 = arith.constant 0 : index
    %c0_6 = arith.constant 0 : index
    %4 = vector.load %arg9[%c0_5, %c0_6] : memref<8x128xf32, #tpu.memory_space<vmem>>, vector<8x128xf32>
    %c0_7 = arith.constant 0 : index
    %c0_8 = arith.constant 0 : index
    %5 = vector.load %arg2[%c0_7, %c0_8] : memref<128x128xf32, #tpu.memory_space<vmem>>, vector<128x128xf32>
    %cst_9 = arith.constant dense<0.000000e+00> : vector<8x128xf32>
    %6 = tpu.matmul %4, %5, %cst_9 {dimension_numbers = #tpu.dot_dimension_numbers<[1], [0], [0], [1], [0, 0, 1, 1], [], []>} : vector<8x128xf32>, vector<128x128xf32>, vector<8x128xf32> -> vector<8x128xf32>
    %c0_10 = arith.constant 0 : index
    %c0_11 = arith.constant 0 : index
    %7 = vector.load %arg3[%c0_10, %c0_11] : memref<1x128xf32, #tpu.memory_space<vmem>>, vector<1x128xf32>
    %8 = vector.broadcast %7 : vector<1x128xf32> to vector<8x128xf32>
    %9 = arith.addf %6, %8 : vector<8x128xf32>
    %cst_12 = arith.constant 0.000000e+00 : f32
    %10 = vector.broadcast %cst_12 : f32 to vector<8x128xf32>
    %11 = arith.maximumf %9, %10 : vector<8x128xf32>
    %c0_13 = arith.constant 0 : index
    %c0_14 = arith.constant 0 : index
    %12 = vector.load %arg4[%c0_13, %c0_14] : memref<128x128xf32, #tpu.memory_space<vmem>>, vector<128x128xf32>
    %cst_15 = arith.constant dense<0.000000e+00> : vector<8x128xf32>
    %13 = tpu.matmul %11, %12, %cst_15 {dimension_numbers = #tpu.dot_dimension_numbers<[1], [0], [0], [1], [0, 0, 1, 1], [], []>} : vector<8x128xf32>, vector<128x128xf32>, vector<8x128xf32> -> vector<8x128xf32>
    %c0_16 = arith.constant 0 : index
    %c0_17 = arith.constant 0 : index
    %14 = vector.load %arg5[%c0_16, %c0_17] : memref<1x128xf32, #tpu.memory_space<vmem>>, vector<1x128xf32>
    %15 = vector.broadcast %14 : vector<1x128xf32> to vector<8x128xf32>
    %16 = arith.addf %13, %15 : vector<8x128xf32>
    %cst_18 = arith.constant 0.000000e+00 : f32
    %17 = vector.broadcast %cst_18 : f32 to vector<8x128xf32>
    %18 = arith.maximumf %16, %17 : vector<8x128xf32>
    %c0_19 = arith.constant 0 : index
    %c0_20 = arith.constant 0 : index
    %19 = vector.load %arg6[%c0_19, %c0_20] : memref<128x128xf32, #tpu.memory_space<vmem>>, vector<128x128xf32>
    %cst_21 = arith.constant dense<0.000000e+00> : vector<8x128xf32>
    %20 = tpu.matmul %18, %19, %cst_21 {dimension_numbers = #tpu.dot_dimension_numbers<[1], [0], [0], [1], [0, 0, 1, 1], [], []>} : vector<8x128xf32>, vector<128x128xf32>, vector<8x128xf32> -> vector<8x128xf32>
    %21 = vector.extract_strided_slice %20 {offsets = [0, 0], sizes = [8, 2], strides = [1, 1]} : vector<8x128xf32> to vector<8x2xf32>
    %c0_22 = arith.constant 0 : index
    %c0_23 = arith.constant 0 : index
    %22 = vector.load %arg7[%c0_22, %c0_23] : memref<1x2xf32, #tpu.memory_space<vmem>>, vector<1x2xf32>
    %23 = vector.broadcast %22 : vector<1x2xf32> to vector<8x2xf32>
    %24 = arith.addf %21, %23 : vector<8x2xf32>
    %c0_24 = arith.constant 0 : index
    %c0_25 = arith.constant 0 : index
    %25 = vector.load %arg8[%c0_24, %c0_25] : memref<8x2xf32, #tpu.memory_space<vmem>>, vector<8x2xf32>
    tpu.vector_store %arg8[%c0_24, %c0_25], %24 {strides = array<i32>} : memref<8x2xf32, #tpu.memory_space<vmem>>, vector<8x2xf32>,
    return
  }
  func.func @transform_0(%arg0: i32) -> (i32, i32) {
    %c0_i32 = arith.constant 0 : i32
    %c0_i32_0 = arith.constant 0 : i32
    return %arg0, %c0_i32 : i32, i32
  }
  func.func @transform_1(%arg0: i32) -> (i32, i32) {
    %c0_i32 = arith.constant 0 : i32
    %c0_i32_0 = arith.constant 0 : i32
    %c0_i32_1 = arith.constant 0 : i32
    return %c0_i32, %c0_i32_0 : i32, i32
  }
  func.func @transform_2(%arg0: i32) -> (i32, i32) {
    %c0_i32 = arith.constant 0 : i32
    %c0_i32_0 = arith.constant 0 : i32
    %c0_i32_1 = arith.constant 0 : i32
    return %c0_i32, %c0_i32_0 : i32, i32
  }
  func.func @transform_3(%arg0: i32) -> (i32, i32) {
    %c0_i32 = arith.constant 0 : i32
    %c0_i32_0 = arith.constant 0 : i32
    %c0_i32_1 = arith.constant 0 : i32
    return %c0_i32, %c0_i32_0 : i32, i32
  }
  func.func @transform_4(%arg0: i32) -> (i32, i32) {
    %c0_i32 = arith.constant 0 : i32
    %c0_i32_0 = arith.constant 0 : i32
    %c0_i32_1 = arith.constant 0 : i32
    return %c0_i32, %c0_i32_0 : i32, i32
  }
  func.func @transform_5(%arg0: i32) -> (i32, i32) {
    %c0_i32 = arith.constant 0 : i32
    %c0_i32_0 = arith.constant 0 : i32
    %c0_i32_1 = arith.constant 0 : i32
    return %c0_i32, %c0_i32_0 : i32, i32
  }
  func.func @transform_6(%arg0: i32) -> (i32, i32) {
    %c0_i32 = arith.constant 0 : i32
    %c0_i32_0 = arith.constant 0 : i32
    %c0_i32_1 = arith.constant 0 : i32
    return %c0_i32, %c0_i32_0 : i32, i32
  }
  func.func @transform_7(%arg0: i32) -> (i32, i32) {
    %c0_i32 = arith.constant 0 : i32
    %c0_i32_0 = arith.constant 0 : i32
    return %arg0, %c0_i32 : i32, i32
  }
}

</mosaic_0001>

<bundles_post_ra>
// kernel: tpu_custom_call.1
= control target key start
LH: loop header
LB: loop body
LE: loop exit
PB: predicated region body
PF: predicated region fallthrough
CT: control target
= control target key end

     0   :  { %12 = vsyncpa [#allocation4], 0  ;;  %s364_s0 = inlined_call_operand.vmem [shape: f32[8,4], index: 0, kind: input, shape index: {}]   ;;  %s365_s1 = inlined_call_operand.hbm [shape: f32[128,128], index: 1, kind: input, shape index: {}]   ;;  %s366_s2 = inlined_call_operand.vmem [shape: f32[1,128], index: 2, kind: input, shape index: {}]   ;;  %s367_s3 = inlined_call_operand.hbm [shape: f32[128,128], index: 3, kind: input, shape index: {}]   ;;  %s368_s4 = inlined_call_operand.vmem [shape: f32[1,128], index: 4, kind: input, shape index: {}]   ;;  %s369_s5 = inlined_call_operand.hbm [shape: f32[128,128], index: 5, kind: input, shape index: {}]   ;;  %s370_s6 = inlined_call_operand.vmem [shape: f32[1,2], index: 6, kind: input, shape index: {}]   ;;  %s371_s7 = inlined_call_operand.vmem [shape: f32[8,2], index: 7, kind: output, shape index: {}]  }
   0x1   :  { %13 = vsyncpa [#allocation6], 0  ;;  %s35_s26 = sshll.u32 %s367_s3, 4  ;;  %s294_s27 = smov [#allocation5]   ;;  %s36_s26 = int_to_ptr.hbm [resolvable:$true] %s35_s26 }
   0x2   :  { %s37_s28 = sshll.u32 %s294_s27, 4  ;;  %s20_s8 = sshll.u32 %s365_s1, 4  ;;  %s38_s28 = int_to_ptr.vmem [resolvable:$true] %s37_s28  ;;  %s21_s8 = int_to_ptr.hbm [resolvable:$true] %s20_s8 }
   0x3   :  { %s295_s9 = smov 128   ;;  %s296_s10 = smov 8  }
   0x4   :  { %43 = dma.hbm_to_vmem [thread:$0]  %s36_s26, 2048, %s38_s28, [#allocation6], %s295_s9, %s295_s9, %s296_s10  }
   0x5   :  { %s297_s11 = smov [#allocation3]   ;;  %s50_s15 = sshll.u32 %s369_s5, 4  ;;  %s51_s15 = int_to_ptr.hbm [resolvable:$true] %s50_s15 }
   0x6   :  { %s22_s12 = sshll.u32 %s297_s11, 4  ;;  %s298_s3 = smov [#allocation7]   ;;  %s23_s12 = int_to_ptr.vmem [resolvable:$true] %s22_s12 }
   0x7   :  { %28 = dma.hbm_to_vmem [thread:$0]  %s21_s8, 2048, %s23_s12, [#allocation4], %s295_s9, %s295_s9, %s296_s10  }
   0x8   :  { %s52_s16 = sshll.u32 %s298_s3, 4  ;;  %s53_s16 = int_to_ptr.vmem [resolvable:$true] %s52_s16 }
   0x9   :  { %58 = dma.hbm_to_vmem [thread:$0]  %s51_s15, 2048, %s53_s16, [#allocation6], %s295_s9, %s295_s9, %s296_s10  }
   0xa   :  { %290 = dma.done.wait [#allocation4], 2048  }
   0xb   :  { %291 = vsyncadd [#allocation4], 4294965248 }
   0xc   :  { %292 = dma.done.wait [#allocation6], 4096  }
   0xd   :  { %293 = vsyncadd [#allocation6], 4294963200  ;;  %v299_v0 = vmov 0.0   ;;  %v93_v1 = vld [vmem:[#allocation3 + $0x78] sm:$0xff]  ;;  %v92_v2 = vld [vmem:[#allocation3 + $0x70] sm:$0xff]  ;;  %vm75_vm0 = vcmask 31744  }
   0xe   :  { %73 = vst [vmem:[#allocation2] sm:$0xff] %v299_v0  ;;  %98 = vmatpush.msra.mxu0 %v93_v1  ;;  %v91_v3 = vld [vmem:[#allocation3 + $0x68] sm:$0xff]  ;;  %v90_v4 = vld [vmem:[#allocation3 + $0x60] sm:$0xff]  ;;  %v74_v5 = vld [vmem:[%s364_s0] sm:$0xff]  ;;  %vm201_vm1 = vcmask 15360  }
   0xf   :  { %v134_v6 = vld [vmem:[#allocation5 + $0x78] sm:$0xff]  ;;  %76 = vst.msk [vmem:[#allocation2] sm:$0xff] %vm75_vm0, %v74_v5  ;;  %v133_v8 = vld [vmem:[#allocation5 + $0x70] sm:$0xff]  ;;  %v132_v9 = vld [vmem:[#allocation5 + $0x68] sm:$0xff] }
  0x10   :  { %99 = vmatpush.msra.mxu0 %v92_v2  ;;  %v89_v7 = vld [vmem:[#allocation3 + $0x58] sm:$0xff]  ;;  %139 = vmatpush.msra.mxu1 %v134_v6  ;;  %v88_v10 = vld [vmem:[#allocation3 + $0x50] sm:$0xff]  ;;  %v131_v11 = vld [vmem:[#allocation5 + $0x60] sm:$0xff] }
  0x11   :  { %v87_v12 = vld [vmem:[#allocation3 + $0x48] sm:$0xff]  ;;  %v130_v13 = vld [vmem:[#allocation5 + $0x58] sm:$0xff]  ;;  %v86_v14 = vld [vmem:[#allocation3 + $0x40] sm:$0xff] }
  0x12   :  { %100 = vmatpush.msra.mxu0 %v91_v3  ;;  %140 = vmatpush.msra.mxu1 %v133_v8  ;;  %v129_v15 = vld [vmem:[#allocation5 + $0x50] sm:$0xff]  ;;  %v85_v16 = vld [vmem:[#allocation3 + $0x38] sm:$0xff]  ;;  %v128_v17 = vld [vmem:[#allocation5 + $0x48] sm:$0xff] }
  0x13   :  { %v84_v18 = vld [vmem:[#allocation3 + $0x30] sm:$0xff]  ;;  %v127_v19 = vld [vmem:[#allocation5 + $0x40] sm:$0xff]  ;;  %v83_v20 = vld [vmem:[#allocation3 + $0x28] sm:$0xff] }
  0x14   :  { %101 = vmatpush.msra.mxu0 %v90_v4  ;;  %141 = vmatpush.msra.mxu1 %v132_v9  ;;  %v126_v21 = vld [vmem:[#allocation5 + $0x38] sm:$0xff]  ;;  %v82_v22 = vld [vmem:[#allocation3 + $0x20] sm:$0xff]  ;;  %v125_v23 = vld [vmem:[#allocation5 + $0x30] sm:$0xff] }
  0x15   :  { %v81_v24 = vld [vmem:[#allocation3 + $0x18] sm:$0xff]  ;;  %v124_v25 = vld [vmem:[#allocation5 + $0x28] sm:$0xff]  ;;  %v80_v26 = vld [vmem:[#allocation3 + $0x10] sm:$0xff] }
  0x16   :  { %102 = vmatpush.msra.mxu0 %v89_v7  ;;  %142 = vmatpush.msra.mxu1 %v131_v11  ;;  %v123_v27 = vld [vmem:[#allocation5 + $0x20] sm:$0xff]  ;;  %v79_v28 = vld [vmem:[#allocation3 + $0x8] sm:$0xff]  ;;  %v122_v29 = vld [vmem:[#allocation5 + $0x18] sm:$0xff] }
  0x17   :  { %v78_v30 = vld [vmem:[#allocation3] sm:$0xff]  ;;  %v77_v31 = vld [vmem:[#allocation2] sm:$0xff]  ;;  %v121_v32 = vld [vmem:[#allocation5 + $0x10] sm:$0xff] }
  0x18   :  { %103 = vmatpush.msra.mxu0 %v88_v10  ;;  %143 = vmatpush.msra.mxu1 %v130_v13  ;;  %v120_v33 = vld [vmem:[#allocation5 + $0x8] sm:$0xff]  ;;  %v119_v34 = vld [vmem:[#allocation5] sm:$0xff]  ;;  %v175_v35 = vld [vmem:[#allocation7 + $0x78] sm:$0xff] }
  0x19   :  { %v174_v36 = vld [vmem:[#allocation7 + $0x70] sm:$0xff]  ;;  %176 = vmatpush.msra.mxu2 %v175_v35  ;;  %v173_v37 = vld [vmem:[#allocation7 + $0x68] sm:$0xff]  ;;  %v172_v38 = vld [vmem:[#allocation7 + $0x60] sm:$0xff] }
  0x1a   :  { %104 = vmatpush.msra.mxu0 %v87_v12  ;;  %144 = vmatpush.msra.mxu1 %v129_v15  ;;  %v171_v39 = vld [vmem:[#allocation7 + $0x58] sm:$0xff]  ;;  %v170_v40 = vld [vmem:[#allocation7 + $0x50] sm:$0xff]  ;;  %v169_v41 = vld [vmem:[#allocation7 + $0x48] sm:$0xff] }
  0x1b   :  { %177 = vmatpush.msra.mxu2 %v174_v36  ;;  %v168_v42 = vld [vmem:[#allocation7 + $0x40] sm:$0xff]  ;;  %v167_v43 = vld [vmem:[#allocation7 + $0x38] sm:$0xff]  ;;  %v166_v44 = vld [vmem:[#allocation7 + $0x30] sm:$0xff] }
  0x1c   :  { %105 = vmatpush.msra.mxu0 %v86_v14  ;;  %145 = vmatpush.msra.mxu1 %v128_v17  ;;  %v165_v45 = vld [vmem:[#allocation7 + $0x28] sm:$0xff]  ;;  %v164_v46 = vld [vmem:[#allocation7 + $0x20] sm:$0xff]  ;;  %v163_v47 = vld [vmem:[#allocation7 + $0x18] sm:$0xff] }
  0x1d   :  { %178 = vmatpush.msra.mxu2 %v173_v37  ;;  %v215_v48 = vld [vmem:[%s366_s2] ss:$0 sm:$0xff]  ;;  %v162_v52 = vld [vmem:[#allocation7 + $0x10] sm:$0xff]  ;;  %v161_v53 = vld [vmem:[#allocation7 + $0x8] sm:$0xff] }
  0x1e   :  { %106 = vmatpush.msra.mxu0 %v85_v16  ;;  %146 = vmatpush.msra.mxu1 %v127_v19  ;;  %v160_v54 = vld [vmem:[#allocation7] sm:$0xff]  ;;  %v216_v55 = vld [vmem:[%s368_s4] ss:$0 sm:$0xff] }
  0x1f   :  { %179 = vmatpush.msra.mxu2 %v172_v38  ;;  %v217_v59 = vld [vmem:[%s370_s6] ss:$0 sm:$0xff] }
  0x20   :  { %107 = vmatpush.msra.mxu0 %v84_v18  ;;  %147 = vmatpush.msra.mxu1 %v126_v21 }
  0x21   :  { %180 = vmatpush.msra.mxu2 %v171_v39 }
  0x22   :  { %108 = vmatpush.msra.mxu0 %v83_v20  ;;  %148 = vmatpush.msra.mxu1 %v125_v23 }
  0x23   :  { %181 = vmatpush.msra.mxu2 %v170_v40 }
  0x24   :  { %109 = vmatpush.msra.mxu0 %v82_v22  ;;  %149 = vmatpush.msra.mxu1 %v124_v25 }
  0x25   :  { %182 = vmatpush.msra.mxu2 %v169_v41 }
  0x26   :  { %110 = vmatpush.msra.mxu0 %v81_v24  ;;  %150 = vmatpush.msra.mxu1 %v123_v27 }
  0x27   :  { %183 = vmatpush.msra.mxu2 %v168_v42 }
  0x28   :  { %111 = vmatpush.msra.mxu0 %v80_v26  ;;  %151 = vmatpush.msra.mxu1 %v122_v29 }
  0x29   :  { %184 = vmatpush.msra.mxu2 %v167_v43 }
  0x2a   :  { %112 = vmatpush.msra.mxu0 %v79_v28  ;;  %152 = vmatpush.msra.mxu1 %v121_v32 }
  0x2b   :  { %185 = vmatpush.msra.mxu2 %v166_v44 }
  0x2c   :  { %113 = vmatpush.msra.mxu0 %v78_v30  ;;  %153 = vmatpush.msra.mxu1 %v120_v33 }
  0x2d   :  { %114 = vmatmul.f32.vlgmr.msra.gmra.mxu0 %v77_v31  ;;  %186 = vmatpush.msra.mxu2 %v165_v45 }
  0x2e   :  { %154 = vmatpush.msra.mxu1 %v119_v34 }
  0x2f   :  { %187 = vmatpush.msra.mxu2 %v164_v46 }
  0x31   :  { %188 = vmatpush.msra.mxu2 %v163_v47 }
  0x33   :  { %189 = vmatpush.msra.mxu2 %v162_v52 }
  0x35   :  { %190 = vmatpush.msra.mxu2 %v161_v53 }
  0x37   :  { %191 = vmatpush.msra.mxu2 %v160_v54 }
  0xaa   :  { %v115_v49 = vpop.f32.mrf.mxu0 }
  0xab   :  { %v116_v50 = vadd.f32 %v215_v48, %v115_v49 }
  0xad   :  { %v118_v51 = vmax.f32 %v116_v50, 0.0 }
  0xaf   :  { %155 = vmatmul.f32.vlgmr.msra.gmra.mxu1 %v118_v51 }
 0x12c   :  { %v156_v56 = vpop.f32.mrf.mxu1 }
 0x12d   :  { %v157_v57 = vadd.f32 %v216_v55, %v156_v56 }
 0x12f   :  { %v159_v58 = vmax.f32 %v157_v57, 0.0 }
 0x131   :  { %192 = vmatmul.f32.vlgmr.msra.gmra.mxu2 %v159_v58 }
 0x1b4   :  { %v193_v60 = vpop.f32.mrf.mxu2 }
 0x1b5   :  { %v200_v61 = vadd.f32 %v217_v59, %v193_v60 }
 0x1b7   :  { %202 = vst.msk [vmem:[%s371_s7] sm:$0xff] %vm201_vm1, %v200_v61 }
 0x1b8   :  { %207 = vsyncpa [#allocation4], 1 }
 0x1b9   :  { %208 = vsyncpa [#allocation6], 1 }

</bundles_post_ra>
